<compile_context>
chip_gen: v6e
topology: v6e:2x2x1
jax: 0.10.0
libtpu: 0.0.40
codegen_flags: <defaults>
</compile_context>

<pallas_src>
import jax
import jax.numpy as jnp
from jax.experimental import pallas as pl
from jax.experimental.pallas import tpu as pltpu


def _copy_kernel(x_ref, o_ref):
    # Single lane-dense, full-block copy: pure data movement, no compute.
    o_ref[...] = x_ref[...]


def _pick_feature_block(F, N, itemsize, target_block_bytes):
    """Largest 128-multiple divisor of F whose (N, bf) block fits the byte
    budget; prefers >= 2 chunks along F so both v7x TCs / megacore get work."""
    if F % 128 != 0:
        # Full-extent block is always legal even if not 128-divisible.
        return F
    k = F // 128
    best = 128
    for d in range(1, k + 1):
        if k % d == 0:
            cand = d * 128
            if N * cand * itemsize <= target_block_bytes:
                best = cand
    if best == F and k >= 2:
        # Keep at least two grid steps along F for dual-TC / megacore overlap.
        for d in range(k // 2, 0, -1):
            if k % d == 0:
                best = d * 128
                break
    return best


def flatten_pallas(x, *, target_block_bytes=4 * 1024 * 1024):
    """Pallas equivalent of torch.flatten(x, start_dim=1)."""
    N = x.shape[0]
    F = 1
    for d in x.shape[1:]:
        F *= d

    # Free metadata reshape: contiguous row-major (N, C, H, W) -> (N, F),
    # bit-identical element ordering to torch.flatten(x, start_dim=1).
    x2 = x.reshape(N, F)

    itemsize = jnp.dtype(x.dtype).itemsize
    bf = _pick_feature_block(F, N, itemsize, target_block_bytes)
    grid = (F // bf,)

    return pl.pallas_call(
        _copy_kernel,
        out_shape=jax.ShapeDtypeStruct((N, F), x.dtype),
        grid=grid,
        # Full batch per block (sublane dim == full N => unmasked stores even
        # for small / non-multiple-of-8 N); lane dim is a multiple of 128.
        in_specs=[pl.BlockSpec((N, bf), lambda j: (0, j))],
        out_specs=pl.BlockSpec((N, bf), lambda j: (0, j)),
        compiler_params=pltpu.CompilerParams(
            dimension_semantics=("parallel",)),
    )(x2)


if __name__ == "__main__":
    key = jax.random.PRNGKey(0)
    # Small NCHW feature map: batch=2, C=4, 16x16 spatial.
    x = jax.random.normal(key, (2, 4, 16, 16), dtype=jnp.float32)

    out = jax.block_until_ready(flatten_pallas(x))

    # Reference: row-major flatten (what torch.flatten(x, 1) does).
    ref = x.reshape(x.shape[0], -1)
    assert out.shape == (2, 4 * 16 * 16), out.shape
    assert out.dtype == x.dtype
    assert jnp.array_equal(out, ref), "Pallas flatten mismatch vs reference"

    print("KERNEL_OK")
</pallas_src>

<mosaic_0001>
module attributes {stable_mosaic.version = 11 : i64} {
  func.func @_copy_kernel(%arg0: i32, %arg1: memref<2x512xf32, #tpu.memory_space<vmem>>, %arg2: memref<2x512xf32, #tpu.memory_space<vmem>>) attributes {dimension_semantics = [#tpu.dimension_semantics<parallel>], iteration_bounds = array<i64: 2>, scalar_prefetch = 0 : i64, scratch_operands = 0 : i64, tpu.core_type = #tpu.core_type<tc>, window_params = [{transform_indices = @transform_0, window_bounds = array<i64: 2, 512>}, {transform_indices = @transform_1, window_bounds = array<i64: 2, 512>}]} {
    %c0 = arith.constant 0 : index
    %c0_0 = arith.constant 0 : index
    %0 = vector.load %arg1[%c0, %c0_0] : memref<2x512xf32, #tpu.memory_space<vmem>>, vector<2x512xf32>
    %c0_1 = arith.constant 0 : index
    %c0_2 = arith.constant 0 : index
    %1 = vector.load %arg2[%c0_1, %c0_2] : memref<2x512xf32, #tpu.memory_space<vmem>>, vector<2x512xf32>
    tpu.vector_store %arg2[%c0_1, %c0_2], %0 {strides = array<i32>} : memref<2x512xf32, #tpu.memory_space<vmem>>, vector<2x512xf32>,
    return
  }
  func.func @transform_0(%arg0: i32) -> (i32, i32) {
    %c0_i32 = arith.constant 0 : i32
    %c0_i32_0 = arith.constant 0 : i32
    return %c0_i32, %arg0 : i32, i32
  }
  func.func @transform_1(%arg0: i32) -> (i32, i32) {
    %c0_i32 = arith.constant 0 : i32
    %c0_i32_0 = arith.constant 0 : i32
    return %c0_i32, %arg0 : i32, i32
  }
}

</mosaic_0001>

<bundles_post_ra>
// kernel: tpu_custom_call.1
= control target key start
LH: loop header
LB: loop body
LE: loop exit
PB: predicated region body
PF: predicated region fallthrough
CT: control target
= control target key end

     0   :  { %6 = vsyncpa [#allocation3], 0  ;;  %s537_s0 = inlined_call_operand.hbm [shape: f32[2,1024], index: 0, kind: input, shape index: {}]   ;;  %s538_s1 = inlined_call_operand.hbm [shape: f32[2,1024], index: 1, kind: output, shape index: {}]  }
   0x1   :  { %8 = vsyncpa [#allocation3 + $0x1], 0 }
   0x2   :  { %9 = vsyncpa [#allocation4], 0 }
   0x3   :  { %11 = vsyncpa [#allocation4 + $0x1], 0  ;;  %s390_s6 = smov 0   ;;  %s392_s7 = smov 0  }
   0x4   :  { %s394_s8 = smov 0   ;;  %s396_s9 = smov 0  }
   0x5 LB: > { %s411_s10 = sadd.s32 4294967295, %s376_s9   ;;  %s222_s11 = sadd.s32 4294967294, %s376_s9   ;;  %s376_s9 = sphi %s396_s9, %s555_s9   ;;  %s372_s8 = sphi %s394_s8, %s554_s8   ;;  %s368_s7 = sphi %s392_s7, %s553_s7   ;;  %s364_s6 = sphi %s390_s6, %s552_s6  }
   0x6   : > { %s415_s12 = sadd.s32 1, %s376_s9   ;;  %s24_s13 = sadd.s32 1, %s372_s8 }
   0x7   : > { %s21_s14 = ssub.s32 %s376_s9, %s415_s12  ;;  %p31_p0 = scmp.ne.s32.totalorder %s372_s8, %s368_s7 }
   0x8   : > { %p22_p1 = scmp.eq.s32.totalorder %s21_s14, 0  ;;  %p32_p2 = scmp.eq.s32.totalorder %s376_s9, 0 }
   0x9   : > { %p37_p3 = scmp.ne.s32.totalorder %s368_s7, %s364_s6  ;;  %p38_p4 = scmp.eq.s32.totalorder %s411_s10, 0 }
   0xa   : > { %s427_s15 = scalar_select %p22_p1, %s372_s8, %s24_s13  }
   0xb   : > { %p429_p5 = por %p32_p2, %p31_p0  ;;  %p433_p6 = por %p38_p4, %p37_p3 }
   0xc   : > { %p61_p7 = scmp.eq.s32.totalorder %s411_s10, 1  ;;  %p67_p8 = scmp.eq.s32.totalorder %s222_s11, 1 }
   0xd   : > { %s542_s17 = scalar_select %p433_p6, 1, 0 }
   0xe   : > { %p250_p10 = scmp.lt.s32.totalorder %s376_s9, 2  ;;  %p440_p11 = por %p61_p7, %p31_p0 }
   0xf   : > { %p444_p12 = por %p67_p8, %p37_p3  ;;  %s87_s20 = sand.u32 1, %s372_s8  }
  0x10   : > { %s543_s18 = scalar_select %p440_p11, 1, 0 }
  0x11   : > { %s544_s19 = scalar_select %p444_p12, 1, 0 }
  0x12   : > { %s236_s21 = sshll.u32 %s376_s9, 7  ;;  %s225_s22 = sshll.u32 %s87_s20, 3 }
  0x13   : > { %s453_s25 = scalar_lea.hbm %s537_s0, %s236_s21  ;;  %s91_s26 = scalar_lea.vmem [#allocation2], %s225_s22 }
  0x14   : > { %s99_s27 = sshll.u32 %s91_s26, 4  ;;  %p457_p13 = pnand %p250_p10, %p429_p5  ;;  %s461_s27 = int_to_ptr.vmem [resolvable:$true] %s99_s27 }
  0x15   : > { %s88_s29 = scalar_lea.sflag [#allocation3], %s87_s20  ;;  %s284_s30 = scalar_lea.hbm %s453_s25, 128 }
  0x16   : > { %p285_p2 = scmp.ne.s32.totalorder %s453_s25, %s284_s30  ;;  %p286_p3 = pneg %p457_p13 }
  0x17   : > { %s289_s4 = scalar_lea.hbm %s537_s0, 256  ;;  %p290_p5 = scmp.lt.s32.totalorder %s453_s25, %s537_s0 }
  0x18   : > { %p287_p4 = pnand %p286_p3, %p285_p2  ;;  %p291_p8 = scmp.lt.s32.totalorder %s289_s4, %s284_s30 }
  0x1a   : > { %p288_p7 = pneg %p287_p4  ;;  %p292_p10 = por %p291_p8, %p290_p5 }
  0x1c   : > { %p293_p9 = pnand %p292_p10, %p288_p7 }
  0x1e   : > { %296 = shalt.err (!%p293_p9)
}
  0x1f   : > { %s297_s13 = scalar_lea.vmem %s461_s27, 128  ;;  %s378_s14 = smov [#allocation2]  }
  0x20   : > { %p298_p0 = scmp.ne.s32.totalorder %s461_s27, %s297_s13  ;;  %s302_s16 = sshll.u32 %s378_s14, 4  ;;  %s303_s16 = int_to_ptr.vmem [resolvable:$false] %s302_s16 }
  0x21   : > { %s304_s20 = scalar_lea.vmem %s303_s16, 256  ;;  %p305_p4 = scmp.lt.s32.totalorder %s461_s27, %s303_s16 }
  0x22   : > { %p300_p1 = pnand %p298_p0, %p286_p3  ;;  %p306_p12 = scmp.lt.s32.totalorder %s304_s20, %s297_s13 }
  0x24   : > { %p301_p2 = pneg %p300_p1  ;;  %p307_p11 = por %p306_p12, %p305_p4 }
  0x26   : > { %p308_p6 = pnand %p307_p11, %p301_p2 }
  0x28   : > { %311 = shalt.err (!%p308_p6)
}
  0x29   : > { %245 = dma.hbm_to_vmem [thread:$0]  (!%p457_p13), %s453_s25, 128, %s461_s27, %s88_s29  }
  0x2a   : > { %p546_p9 = scmp.lt.s32.totalorder %s376_s9, 3  ;;  %p547_p7 = scmp.ge.s32.totalorder %s376_s9, 1 }
  0x2c   : > { %p105_p0 = pnand %p547_p7, %p546_p9 }
  0x2d   : > { %s488_s21 = sand.u32 (!%p105_p0), 1, %s368_s7   ;;  %p548_p6 = scmp.ne.s32.totalorder (!%p105_p0), %s542_s17, 0 }
  0x2e   : > { %108 = sbr.rel (%p105_p0) target bundleno = 77 (0x4d), region = 24  ;;  %s229_s22 = sshll.u32 (!%p105_p0), %s488_s21, 3 }
  0x2f   : > { %s111_s23 = scalar_lea.sflag (!%p105_p0), [#allocation3], %s488_s21  ;;  %s114_s24 = scalar_lea.vmem (!%p105_p0), [#allocation2], %s229_s22 }
  0x33   : > { %355 = dma.done.wait (%p548_p6), %s111_s23, 128  }
  0x34   : > { %357 = vsyncadd (%p548_p6), %s111_s23, 4294967168  ;;  %s132_s25 = scalar_lea.vmem [#allocation5], %s229_s22  ;;  %s237_s27 = sshll.u32 %s411_s10, 7  ;;  %v135_v0 = vld [vmem:[%s114_s24] sm:$0xff] }
  0x35   : > { %s152_s26 = sshll.u32 %s132_s25, 4  ;;  %s150_s30 = scalar_lea.hbm %s538_s1, %s237_s27  ;;  %136 = vst [vmem:[%s132_s25] sm:$0xff] %v135_v0  ;;  %s497_s26 = int_to_ptr.vmem [resolvable:$true] %s152_s26 }
  0x36   : > { %s138_s2 = scalar_lea.sflag [#allocation4], %s488_s21  ;;  %s312_s17 = scalar_lea.vmem %s497_s26, 128 }
  0x37   : > { %p313_p11 = scmp.ne.s32.totalorder %s497_s26, %s312_s17  ;;  %p549_p12 = scmp.ne.s32.totalorder %s543_s18, 0 }
  0x38   : > { %s379_s3 = smov [#allocation5]  }
  0x39   : > { %p314_p13 = pnand %p313_p11, %p549_p12  ;;  %s316_s4 = sshll.u32 %s379_s3, 4  ;;  %s317_s4 = int_to_ptr.vmem [resolvable:$false] %s316_s4 }
  0x3a   : > { %s318_s10 = scalar_lea.vmem %s317_s4, 256  ;;  %p319_p3 = scmp.lt.s32.totalorder %s497_s26, %s317_s4 }
  0x3b   : > { %p315_p1 = pneg %p314_p13  ;;  %p320_p5 = scmp.lt.s32.totalorder %s318_s10, %s312_s17 }
  0x3d   : > { %p321_p8 = por %p320_p5, %p319_p3 }
  0x3f   : > { %p322_p10 = pnand %p321_p8, %p315_p1 }
  0x41   : > { %325 = shalt.err (!%p322_p10)
}
  0x42   : > { %s326_s5 = scalar_lea.hbm %s150_s30, 128  ;;  %s330_s14 = scalar_lea.hbm %s538_s1, 256 }
  0x43   : > { %p327_p2 = scmp.ne.s32.totalorder %s150_s30, %s326_s5  ;;  %p331_p7 = scmp.lt.s32.totalorder %s150_s30, %s538_s1 }
  0x44   : > { %p332_p0 = scmp.lt.s32.totalorder %s330_s14, %s326_s5 }
  0x45   : > { %p328_p4 = pnand %p327_p2, %p549_p12 }
  0x46   : > { %p333_p6 = por %p332_p0, %p331_p7 }
  0x47   : > { %p329_p9 = pneg %p328_p4 }
  0x49   : > { %p334_p11 = pnand %p333_p6, %p329_p9 }
  0x4b   : > { %337 = shalt.err (!%p334_p11)
}
  0x4c   : > { %240 = dma.vmem_to_hbm [thread:$0]  (%p549_p12), %s497_s26, 128, %s150_s30, %s138_s2  }
  0x4d PF: > { %s164_s21 = sand.u32 1, %s364_s6   ;;  %p550_p13 = scmp.ne.s32.totalorder %s544_s19, 0 }
  0x4e   : > { %p551_p1 = scmp.ge.s32.totalorder %s376_s9, 2  ;;  %s165_s22 = scalar_lea.sflag [#allocation4], %s164_s21 }
  0x50   : > { %p247_p3 = pnand %p551_p1, %p550_p13 }
  0x52   : > { %p248_p5 = pneg %p247_p3 }
  0x54   : > { %359 = dma.done.wait (%p248_p5), %s165_s22, 128  }
  0x55   : > { %361 = vsyncadd (%p248_p5), %s165_s22, 4294967168  ;;  %p14_p8 = scmp.ge.s32.totalorder %s415_s12, 4   ;;  %s552_s6 = smov %s368_s7 }
  0x56   : > { %s553_s7 = smov %s372_s8  ;;  %s554_s8 = smov %s427_s15 }
  0x57   : > { %s555_s9 = smov %s415_s12  ;;  %16 = sbr.rel (!%p14_p8) target bundleno = 5 (0x5), region = 69 }
  0x5c   :  { %170 = vsyncpa [#allocation3], 1 }
  0x5d   :  { %172 = vsyncpa [#allocation3 + $0x1], 1 }
  0x5e   :  { %173 = vsyncpa [#allocation4], 1 }
  0x5f   :  { %175 = vsyncpa [#allocation4 + $0x1], 1 }

</bundles_post_ra>
